<compile_context>
chip_gen: v5e
topology: v5e:2x2
jax: 0.10.0
libtpu: 0.0.40
codegen_flags: <defaults>
</compile_context>

<pallas_src>
import jax
import jax.numpy as jnp
from jax import lax
from jax.experimental import pallas as pl
from jax.experimental.pallas import tpu as pltpu


def _vq_kernel(x_ref, e_ref, et_ref, e2h_ref, q_ref, ind_ref):
    # x_ref:   (1, D, TT)  channels-first tile of input vectors (one batch row)
    # e_ref:   (K, D)      codebook (resident every grid step)
    # et_ref:  (D, K)      codebook transposed (resident)
    # e2h_ref: (K, 1)      0.5 * ||e_k||^2, precomputed in the wrapper
    # q_ref:   (1, D, TT)  quantized output tile
    # ind_ref: (1, 1, TT)  int32 nearest-code indices (lane-dense last dim)
    xb = x_ref[0].astype(jnp.float32)                 # (D, TT)
    e = e_ref[...]                                    # (K, D) f32
    et = et_ref[...]                                  # (D, K) f32
    e2h = e2h_ref[...]                                # (K, 1) f32
    k = e.shape[0]
    tt = xb.shape[1]

    # argmin_k ||x_t - e_k||^2  ==  argmax_k (e_k . x_t - 0.5*||e_k||^2)
    # (the ||x_t||^2 term is constant per column and is dropped)
    scores = jnp.dot(e, xb, preferred_element_type=jnp.float32)   # (K, TT)  MXU
    dist = scores - e2h                                           # (K, TT)

    # first-index argmax over K (sublane axis): max, then min index among ties
    m = jnp.max(dist, axis=0, keepdims=True)                      # (1, TT)
    iota_k = lax.broadcasted_iota(jnp.int32, (k, tt), 0)          # (K, TT)
    ind = jnp.min(jnp.where(dist == m, iota_k, k),
                  axis=0, keepdims=True)                          # (1, TT) int32
    ind_ref[...] = ind[None].astype(jnp.int32)                    # (1, 1, TT)

    # codebook lookup via one-hot matmul (exact for 0/1 weights): q[:, t] = e[ind[t]]
    onehot = (iota_k == ind).astype(jnp.float32)                  # (K, TT)
    q = jnp.dot(et, onehot, preferred_element_type=jnp.float32)   # (D, TT)  MXU
    q_ref[...] = q[None].astype(q_ref.dtype)


def _round_up(a, b):
    return ((a + b - 1) // b) * b


def vq_forward(motion_input, embed, *, tile_t=256):
    """motion_input: (B, D, T) channels-first; embed: (K, D) codebook."""
    B, D, T = motion_input.shape
    K = embed.shape[0]

    # Lane-aligned time tile; pad T so every grid step is full.
    tile_t = min(tile_t, _round_up(T, 128))
    tile_t = _round_up(tile_t, 128)
    T_pad = _round_up(T, tile_t)
    x = motion_input
    if T_pad != T:
        x = jnp.pad(x, ((0, 0), (0, 0), (0, T_pad - T)))

    embed_f = embed.astype(jnp.float32)
    embed_t = embed_f.T                                                  # (D, K), one-time, tiny
    e2_half = 0.5 * jnp.sum(embed_f * embed_f, axis=-1, keepdims=True)   # (K, 1), hoisted

    grid = (B, T_pad // tile_t)
    quant, ind = pl.pallas_call(
        _vq_kernel,
        out_shape=(
            jax.ShapeDtypeStruct((B, D, T_pad), motion_input.dtype),
            jax.ShapeDtypeStruct((B, 1, T_pad), jnp.int32),
        ),
        grid_spec=pltpu.PrefetchScalarGridSpec(
            num_scalar_prefetch=0,
            grid=grid,
            in_specs=[
                pl.BlockSpec((1, D, tile_t), lambda b, t: (b, 0, t)),   # x tile
                pl.BlockSpec((K, D), lambda b, t: (0, 0)),              # codebook
                pl.BlockSpec((D, K), lambda b, t: (0, 0)),              # codebook^T
                pl.BlockSpec((K, 1), lambda b, t: (0, 0)),              # 0.5*|e|^2
            ],
            out_specs=[
                pl.BlockSpec((1, D, tile_t), lambda b, t: (b, 0, t)),   # quantize tile
                pl.BlockSpec((1, 1, tile_t), lambda b, t: (b, 0, t)),   # indices tile
            ],
        ),
        compiler_params=pltpu.CompilerParams(
            dimension_semantics=("parallel", "parallel")),
    )(x, embed_f, embed_t, e2_half)

    quantize = quant[:, :, :T] if T_pad != T else quant
    embed_ind = ind[:, 0, :T]
    # TODO(synk): commitment loss / EMA codebook update / kmeans init are training-only
    # statefulness; eval-mode loss is a zero tensor of shape (1,).
    loss = jnp.zeros((1,), jnp.float32)
    return quantize, embed_ind, loss


def _reference(motion_input, embed):
    """Pure-JAX reference of the same forward (for sanity check)."""
    B, D, T = motion_input.shape
    x = jnp.transpose(motion_input, (0, 2, 1)).reshape(B * T, D).astype(jnp.float32)
    e = embed.astype(jnp.float32)
    dist = -(jnp.sum(x * x, -1, keepdims=True) - 2.0 * x @ e.T + jnp.sum(e * e, -1)[None, :])
    ind = jnp.argmax(dist, axis=-1).astype(jnp.int32)
    q = e[ind].reshape(B, T, D).transpose(0, 2, 1).astype(motion_input.dtype)
    return q, ind.reshape(B, T), jnp.zeros((1,), jnp.float32)


if __name__ == "__main__":
    key = jax.random.PRNGKey(0)

    # Small shapes consistent with the module (dimension=128, codebook=256):
    # one tiny case (T < tile) and one padded multi-tile case.
    for (B, D, T, K) in [(2, 128, 16, 256), (2, 128, 300, 256)]:
        kx, ke, key = jax.random.split(key, 3)
        motion_input = jax.random.normal(kx, (B, D, T), dtype=jnp.float32)
        # deterministic synthetic codebook (stands in for kmeans-initialized embed)
        embed = jax.random.normal(ke, (K, D), dtype=jnp.float32)

        quantize, embed_ind, loss = jax.jit(vq_forward)(motion_input, embed)
        jax.block_until_ready((quantize, embed_ind, loss))

        q_ref, ind_ref, loss_ref = _reference(motion_input, embed)
        assert quantize.shape == (B, D, T) and embed_ind.shape == (B, T) and loss.shape == (1,)
        assert jnp.array_equal(embed_ind, ind_ref), "index mismatch"
        assert jnp.allclose(quantize, q_ref, atol=1e-5, rtol=1e-5), "quantize mismatch"
        assert jnp.allclose(loss, loss_ref)

    print("KERNEL_OK")
</pallas_src>

<mosaic_0001>
module attributes {stable_mosaic.version = 11 : i64} {
  func.func @_vq_kernel(%arg0: i32, %arg1: i32, %arg2: memref<1x128x128xf32, #tpu.memory_space<vmem>>, %arg3: memref<256x128xf32, #tpu.memory_space<vmem>>, %arg4: memref<128x256xf32, #tpu.memory_space<vmem>>, %arg5: memref<256x1xf32, #tpu.memory_space<vmem>>, %arg6: memref<1x128x128xf32, #tpu.memory_space<vmem>>, %arg7: memref<1x1x128xi32, #tpu.memory_space<vmem>>) attributes {dimension_semantics = [#tpu.dimension_semantics<parallel>, #tpu.dimension_semantics<parallel>], iteration_bounds = array<i64: 2, 1>, scalar_prefetch = 0 : i64, scratch_operands = 0 : i64, tpu.core_type = #tpu.core_type<tc>, window_params = [{transform_indices = @transform_0, window_bounds = array<i64: 1, 128, 128>}, {pipeline_mode = #tpu.pipeline_mode<synchronous>, transform_indices = @transform_1, window_bounds = array<i64: 256, 128>}, {pipeline_mode = #tpu.pipeline_mode<synchronous>, transform_indices = @transform_2, window_bounds = array<i64: 128, 256>}, {pipeline_mode = #tpu.pipeline_mode<synchronous>, transform_indices = @transform_3, window_bounds = array<i64: 256, 1>}, {transform_indices = @transform_4, window_bounds = array<i64: 1, 128, 128>}, {transform_indices = @transform_5, window_bounds = array<i64: 1, 1, 128>}]} {
    %c0 = arith.constant 0 : index
    %c0_0 = arith.constant 0 : index
    %c0_1 = arith.constant 0 : index
    %0 = vector.load %arg2[%c0, %c0_0, %c0_1] : memref<1x128x128xf32, #tpu.memory_space<vmem>>, vector<1x128x128xf32>
    %1 = vector.shape_cast %0 : vector<1x128x128xf32> to vector<128x128xf32>
    %c0_2 = arith.constant 0 : index
    %c0_3 = arith.constant 0 : index
    %2 = vector.load %arg3[%c0_2, %c0_3] : memref<256x128xf32, #tpu.memory_space<vmem>>, vector<256x128xf32>
    %c0_4 = arith.constant 0 : index
    %c0_5 = arith.constant 0 : index
    %3 = vector.load %arg4[%c0_4, %c0_5] : memref<128x256xf32, #tpu.memory_space<vmem>>, vector<128x256xf32>
    %c0_6 = arith.constant 0 : index
    %c0_7 = arith.constant 0 : index
    %4 = vector.load %arg5[%c0_6, %c0_7] : memref<256x1xf32, #tpu.memory_space<vmem>>, vector<256x1xf32>
    %cst = arith.constant dense<0.000000e+00> : vector<256x128xf32>
    %5 = tpu.matmul %2, %1, %cst {dimension_numbers = #tpu.dot_dimension_numbers<[1], [0], [0], [1], [0, 0, 1, 1], [], []>} : vector<256x128xf32>, vector<128x128xf32>, vector<256x128xf32> -> vector<256x128xf32>
    %6 = vector.broadcast %4 : vector<256x1xf32> to vector<256x128xf32>
    %7 = arith.subf %5, %6 : vector<256x128xf32>
    %cst_8 = arith.constant dense<0xFF800000> : vector<128xf32>
    %8 = vector.multi_reduction <maximumf>, %7, %cst_8 [0] : vector<256x128xf32> to vector<128xf32>
    %9 = vector.shape_cast %8 : vector<128xf32> to vector<1x128xf32>
    %10 = tpu.iota {dimensions = array<i32: 0>} : vector<256x128xi32>
    %11 = vector.broadcast %9 : vector<1x128xf32> to vector<256x128xf32>
    %12 = arith.cmpf oeq, %7, %11 : vector<256x128xf32>
    %c256_i32 = arith.constant 256 : i32
    %13 = vector.broadcast %c256_i32 : i32 to vector<256x128xi32>
    %14 = arith.select %12, %10, %13 : vector<256x128xi1>, vector<256x128xi32>
    %cst_9 = arith.constant dense<2147483647> : vector<128xi32>
    %15 = vector.multi_reduction <minsi>, %14, %cst_9 [0] : vector<256x128xi32> to vector<128xi32>
    %16 = vector.shape_cast %15 : vector<128xi32> to vector<1x128xi32>
    %17 = vector.shape_cast %16 : vector<1x128xi32> to vector<1x1x128xi32>
    %c0_10 = arith.constant 0 : index
    %c0_11 = arith.constant 0 : index
    %c0_12 = arith.constant 0 : index
    %18 = vector.load %arg7[%c0_10, %c0_11, %c0_12] : memref<1x1x128xi32, #tpu.memory_space<vmem>>, vector<1x1x128xi32>
    tpu.vector_store %arg7[%c0_10, %c0_11, %c0_12], %17 {strides = array<i32>} : memref<1x1x128xi32, #tpu.memory_space<vmem>>, vector<1x1x128xi32>,
    %19 = vector.broadcast %16 : vector<1x128xi32> to vector<256x128xi32>
    %20 = arith.cmpi eq, %10, %19 : vector<256x128xi32>
    %21 = arith.extui %20 : vector<256x128xi1> to vector<256x128xi32>
    %22 = arith.sitofp %21 : vector<256x128xi32> to vector<256x128xf32>
    %cst_13 = arith.constant dense<0.000000e+00> : vector<128x128xf32>
    %23 = tpu.matmul %3, %22, %cst_13 {dimension_numbers = #tpu.dot_dimension_numbers<[1], [0], [0], [1], [0, 0, 1, 1], [], []>} : vector<128x256xf32>, vector<256x128xf32>, vector<128x128xf32> -> vector<128x128xf32>
    %24 = vector.shape_cast %23 : vector<128x128xf32> to vector<1x128x128xf32>
    %c0_14 = arith.constant 0 : index
    %c0_15 = arith.constant 0 : index
    %c0_16 = arith.constant 0 : index
    %25 = vector.load %arg6[%c0_14, %c0_15, %c0_16] : memref<1x128x128xf32, #tpu.memory_space<vmem>>, vector<1x128x128xf32>
    tpu.vector_store %arg6[%c0_14, %c0_15, %c0_16], %24 {strides = array<i32>} : memref<1x128x128xf32, #tpu.memory_space<vmem>>, vector<1x128x128xf32>,
    return
  }
  func.func @transform_0(%arg0: i32, %arg1: i32) -> (i32, i32, i32) {
    %c0_i32 = arith.constant 0 : i32
    %c0_i32_0 = arith.constant 0 : i32
    return %arg0, %c0_i32, %arg1 : i32, i32, i32
  }
  func.func @transform_1(%arg0: i32, %arg1: i32) -> (i32, i32) {
    %c0_i32 = arith.constant 0 : i32
    %c0_i32_0 = arith.constant 0 : i32
    %c0_i32_1 = arith.constant 0 : i32
    return %c0_i32, %c0_i32_0 : i32, i32
  }
  func.func @transform_2(%arg0: i32, %arg1: i32) -> (i32, i32) {
    %c0_i32 = arith.constant 0 : i32
    %c0_i32_0 = arith.constant 0 : i32
    %c0_i32_1 = arith.constant 0 : i32
    return %c0_i32, %c0_i32_0 : i32, i32
  }
  func.func @transform_3(%arg0: i32, %arg1: i32) -> (i32, i32) {
    %c0_i32 = arith.constant 0 : i32
    %c0_i32_0 = arith.constant 0 : i32
    %c0_i32_1 = arith.constant 0 : i32
    return %c0_i32, %c0_i32_0 : i32, i32
  }
  func.func @transform_4(%arg0: i32, %arg1: i32) -> (i32, i32, i32) {
    %c0_i32 = arith.constant 0 : i32
    %c0_i32_0 = arith.constant 0 : i32
    return %arg0, %c0_i32, %arg1 : i32, i32, i32
  }
  func.func @transform_5(%arg0: i32, %arg1: i32) -> (i32, i32, i32) {
    %c0_i32 = arith.constant 0 : i32
    %c0_i32_0 = arith.constant 0 : i32
    return %arg0, %c0_i32, %arg1 : i32, i32, i32
  }
}

</mosaic_0001>

<bundles_post_ra>
// kernel: vq_forward.1
= control target key start
LH: loop header
LB: loop body
LE: loop exit
PB: predicated region body
PF: predicated region fallthrough
CT: control target
= control target key end

     0   :  { %11 = vsyncpa [#allocation3], 0  ;;  %s2482_s0 = inlined_call_operand.vmem [shape: f32[2,128,128], index: 0, kind: input, shape index: {}]   ;;  %s2483_s1 = inlined_call_operand.vmem [shape: f32[256,128], index: 1, kind: input, shape index: {}]   ;;  %s2484_s2 = inlined_call_operand.vmem [shape: f32[128,256], index: 2, kind: input, shape index: {}]   ;;  %s2485_s3 = inlined_call_operand.vmem [shape: f32[256,1], index: 3, kind: input, shape index: {}]   ;;  %s2486_s4 = inlined_call_operand.vmem [shape: f32[2,128,128], index: 4, kind: output, shape index: {0}]   ;;  %s2487_s5 = inlined_call_operand.hbm [shape: s32[2,1,128], index: 5, kind: output, shape index: {1}]  }
   0x1   :  { %13 = vsyncpa [#allocation3 + $0x1], 0  ;;  %s1529_s18 = smov 0   ;;  %s1531_s19 = smov 0  }
   0x2   :  { %s1533_s20 = smov 0   ;;  %s1535_s21 = smov 0  }
   0x3   :  { %s1537_s22 = smov 0   ;;  %s1539_s23 = smov 0  }
   0x4 LB: > { %s1264_s24 = sadd.s32 4294967295, %s1495_s23   ;;  %s1265_s25 = sadd.s32 4294967294, %s1495_s23   ;;  %s1495_s23 = sphi %s1539_s23, %s19_s23   ;;  %s1491_s22 = sphi %s1537_s22, %s2556_s22   ;;  %s1487_s21 = sphi %s1535_s21, %s2555_s21   ;;  %s1483_s20 = sphi %s1533_s20, %s2554_s20   ;;  %s1479_s19 = sphi %s1531_s19, %s2553_s19   ;;  %s1475_s18 = sphi %s1529_s18, %s2552_s18  }
   0x5   : > { %s31_s26 = sadd.s32 1, %s1491_s22  ;;  %s159_s27 = sadd.s32 1, %s1483_s20 }
   0x6   : > { %p33_p0 = scmp.ge.s32.totalorder %s31_s26, 2  ;;  %p169_p1 = scmp.ne.s32.totalorder %s1483_s20, %s1479_s19 }
   0x7   : > { %p170_p2 = scmp.eq.s32.totalorder %s1264_s24, 1  ;;  %p175_p3 = scmp.ne.s32.totalorder %s1479_s19, %s1475_s18 }
   0x8   : > { %s2558_s26 = smov (%p33_p0, %s31_s26), 0  ;;  %p176_p5 = scmp.eq.s32.totalorder %s1265_s25, 1 }
   0x9   : > { %p1569_p4 = por %p170_p2, %p169_p1  ;;  %s154_s29 = ssub.s32 %s1491_s22, %s2558_s26 }
   0xa   : > { %p1268_p6 = scmp.ge.s32.totalorder %s1495_s23, 1  ;;  %p157_p7 = scmp.eq.s32.totalorder %s154_s29, 0 }
   0xb   : > { %p1576_p8 = por %p176_p5, %p175_p3  ;;  %p214_p9 = scmp.lt.s32.totalorder %s1495_s23, 3 }
   0xc   : > { %s1582_s6 = scalar_select %p157_p7, %s1483_s20, %s159_s27  }
   0xd   : > { %p215_p10 = pnand %p1268_p6, %p214_p9 }
   0xf   : > { %218 = sbr.rel (%p215_p10) target bundleno = 665 (0x299), region = 36 }
  0x14   : > { %p252_p11 = scmp.lt.s32.totalorder %s1487_s21, 1  ;;  %v350_v0 = vld [vmem:[%s2485_s3 + $0x10] sm:$0xff]  ;;  %v348_v1 = vld [vmem:[%s2485_s3] sm:$0xff]  ;;  %v1497_v2 = vmov 0   ;;  %v351_v5 = vld [vmem:[%s2485_s3 + $0x18] sm:$0xff]  ;;  %s250_s9 = sand.u32 1, %s1479_s19  }
  0x15   : > { %1415 = vset.pattern.permute.xlu1 %v1497_v2  ;;  %1414 = vset.pattern.permute.xlu0 %v1497_v2  ;;  %v349_v6 = vld [vmem:[%s2485_s3 + $0x8] sm:$0xff]  ;;  %v352_v11 = vld [vmem:[%s2485_s3 + $0x20] sm:$0xff]  ;;  %v355_v12 = vld [vmem:[%s2485_s3 + $0x38] sm:$0xff]  ;;  %s2225_s10 = scalar_lea.vmem [#allocation2], %s250_s9  ;;  %s1154_s13 = scalar_lea.hbm %s2487_s5, %s1487_s21 }
  0x16   : > { %s1592_s11 = scalar_select %p252_p11, %s1487_s21, 1  ;;  %505 = vperm.xlu1 %1415, %v350_v0   ;;  %495 = vperm.xlu0 %1414, %v348_v1   ;;  %v354_v13 = vld [vmem:[%s2485_s3 + $0x30] sm:$0xff]  ;;  %v353_v18 = vld [vmem:[%s2485_s3 + $0x28] sm:$0xff]  ;;  %v356_v25 = vld [vmem:[%s2485_s3 + $0x40] sm:$0xff] }
  0x17   : > { %1416 = vset.pattern.permute.xlu2 %v1497_v2  ;;  %v358_v19 = vld [vmem:[%s2485_s3 + $0x50] sm:$0xff]  ;;  %v357_v20 = vld [vmem:[%s2485_s3 + $0x48] sm:$0xff]  ;;  %v360_v27 = vld [vmem:[%s2485_s3 + $0x60] sm:$0xff]  ;;  %s1156_s14 = sshll.u32 %s2225_s10, 4  ;;  %s1158_s16 = sshll.u32 %s1154_s13, 4  ;;  %s1157_s14 = int_to_ptr.vmem [resolvable:$true] %s1156_s14  ;;  %s1159_s16 = int_to_ptr.hbm [resolvable:$true] %s1158_s16 }
  0x18   : > { %s2503_s12 = sshll.u32 %s1592_s11, 7  ;;  %515 = vperm.xlu2 %1416, %v352_v11   ;;  %v361_v26 = vld [vmem:[%s2485_s3 + $0x68] sm:$0xff]  ;;  %v284_v30 = vld [vmem:[%s2483_s1] sm:$0xff]  ;;  %v359_v32 = vld [vmem:[%s2485_s3 + $0x58] sm:$0xff]  ;;  %s1142_s17 = scalar_lea.sflag [#allocation3], %s250_s9 }
  0x19   : > { %s1600_s15 = scalar_lea.vmem %s2482_s0, %s2503_s12  ;;  %v300_v31 = vld [vmem:[%s2483_s1 + $0x80] sm:$0xff]  ;;  %v363_v34 = vld [vmem:[%s2485_s3 + $0x78] sm:$0xff]  ;;  %v285_v35 = vld [vmem:[%s2483_s1 + $0x8] sm:$0xff]  ;;  %s1431_s24 = sshra.s32 %s1159_s16, 4  ;;  %s1432_s24 = int_to_ptr.hbm [resolvable:$true] %s1431_s24 }
  0x1a   : > { %v283_v3 = vld [vmem:[%s1600_s15 + $0x78] sm:$0xff]  ;;  %v282_v4 = vld [vmem:[%s1600_s15 + $0x70] sm:$0xff]  ;;  %v281_v7 = vld [vmem:[%s1600_s15 + $0x68] sm:$0xff]  ;;  %s1433_s25 = scalar_lea.hbm %s1432_s24, 1  ;;  %s1437_s29 = scalar_lea.hbm %s2487_s5, 2 }
  0x1b   : > { %380 = vmatpush.msra.mxu0 %v283_v3  ;;  %1341 = vmatpush.msra.mxu3 %v283_v3  ;;  %v280_v8 = vld [vmem:[%s1600_s15 + $0x60] sm:$0xff]  ;;  %v279_v9 = vld [vmem:[%s1600_s15 + $0x58] sm:$0xff]  ;;  %v278_v10 = vld [vmem:[%s1600_s15 + $0x50] sm:$0xff]  ;;  %p1434_p12 = scmp.ne.s32.totalorder %s1432_s24, %s1433_s25  ;;  %p1438_p1 = scmp.lt.s32.totalorder %s1432_s24, %s2487_s5 }
  0x1c   : > { %v277_v14 = vld [vmem:[%s1600_s15 + $0x48] sm:$0xff]  ;;  %v276_v15 = vld [vmem:[%s1600_s15 + $0x40] sm:$0xff]  ;;  %v275_v16 = vld [vmem:[%s1600_s15 + $0x38] sm:$0xff]  ;;  %p1439_p2 = scmp.lt.s32.totalorder %s1437_s29, %s1433_s25 }
  0x1d   : > { %381 = vmatpush.msra.mxu0 %v282_v4  ;;  %1342 = vmatpush.msra.mxu3 %v282_v4  ;;  %v274_v17 = vld [vmem:[%s1600_s15 + $0x30] sm:$0xff]  ;;  %v273_v21 = vld [vmem:[%s1600_s15 + $0x28] sm:$0xff]  ;;  %v272_v22 = vld [vmem:[%s1600_s15 + $0x20] sm:$0xff]  ;;  %p1435_p13 = pnand %p1434_p12, %p1569_p4 }
  0x1e   : > { %510 = vperm.xlu1 %1415, %v351_v5   ;;  %500 = vperm.xlu0 %1414, %v349_v6   ;;  %v271_v23 = vld [vmem:[%s1600_s15 + $0x18] sm:$0xff]  ;;  %v270_v24 = vld [vmem:[%s1600_s15 + $0x10] sm:$0xff]  ;;  %v269_v28 = vld [vmem:[%s1600_s15 + $0x8] sm:$0xff]  ;;  %p1440_p3 = por %p1439_p2, %p1438_p1 }
  0x1f   : > { %382 = vmatpush.msra.mxu0 %v281_v7  ;;  %1343 = vmatpush.msra.mxu3 %v281_v7  ;;  %v268_v29 = vld [vmem:[%s1600_s15] sm:$0xff]  ;;  %v301_v36 = vld [vmem:[%s2483_s1 + $0x88] sm:$0xff]  ;;  %v362_v37 = vld [vmem:[%s2485_s3 + $0x70] sm:$0xff]  ;;  %p1436_p0 = pneg %p1435_p13 }
  0x20   : > { %520 = vperm.xlu2 %1416, %v353_v18   ;;  %v364_v33 = vld [vmem:[%s2485_s3 + $0x80] sm:$0xff]  ;;  %v367_v38 = vld [vmem:[%s2485_s3 + $0x98] sm:$0xff]  ;;  %v366_v39 = vld [vmem:[%s2485_s3 + $0x90] sm:$0xff] }
  0x21   : > { %383 = vmatpush.msra.mxu0 %v280_v8  ;;  %1344 = vmatpush.msra.mxu3 %v280_v8  ;;  %v286_v40 = vld [vmem:[%s2483_s1 + $0x10] sm:$0xff]  ;;  %v365_v42 = vld [vmem:[%s2485_s3 + $0x88] sm:$0xff]  ;;  %v287_v45 = vld [vmem:[%s2483_s1 + $0x18] sm:$0xff]  ;;  %p1441_p5 = pnand %p1440_p3, %p1436_p0 }
  0x22   : > { %v302_v41 = vld [vmem:[%s2483_s1 + $0x90] sm:$0xff]  ;;  %v369_v44 = vld [vmem:[%s2485_s3 + $0xa8] sm:$0xff]  ;;  %v303_v46 = vld [vmem:[%s2483_s1 + $0x98] sm:$0xff] }
  0x23   : > { %384 = vmatpush.msra.mxu0 %v279_v9  ;;  %1345 = vmatpush.msra.mxu3 %v279_v9  ;;  %v370_v43 = vld [vmem:[%s2485_s3 + $0xb0] sm:$0xff]  ;;  %v373_v47 = vld [vmem:[%s2485_s3 + $0xc8] sm:$0xff]  ;;  %v372_v48 = vld [vmem:[%s2485_s3 + $0xc0] sm:$0xff] }
  0x24   : > { %v288_v49 = vld [vmem:[%s2483_s1 + $0x20] sm:$0xff]  ;;  %v375_v53 = vld [vmem:[%s2485_s3 + $0xd8] sm:$0xff]  ;;  %v289_v54 = vld [vmem:[%s2483_s1 + $0x28] sm:$0xff] }
  0x25   : > { %385 = vmatpush.msra.mxu0 %v278_v10  ;;  %1346 = vmatpush.msra.mxu3 %v278_v10  ;;  %v304_v50 = vld [vmem:[%s2483_s1 + $0xa0] sm:$0xff]  ;;  %v305_v55 = vld [vmem:[%s2483_s1 + $0xa8] sm:$0xff]  ;;  %v371_v56 = vld [vmem:[%s2485_s3 + $0xb8] sm:$0xff] }
  0x26   : > { %530 = vperm.xlu1 %1415, %v355_v12   ;;  %525 = vperm.xlu0 %1414, %v354_v13   ;;  %v368_v51 = vld [vmem:[%s2485_s3 + $0xa0] sm:$0xff]  ;;  %v379_v57 = vld [vmem:[%s2485_s3 + $0xf8] sm:$0xff]  ;;  %v378_v58 = vld [vmem:[%s2485_s3 + $0xf0] sm:$0xff] }
  0x27   : > { %386 = vmatpush.msra.mxu0 %v277_v14  ;;  %1347 = vmatpush.msra.mxu3 %v277_v14  ;;  %v376_v52 = vld [vmem:[%s2485_s3 + $0xe0] sm:$0xff]  ;;  %v290_v59 = vld [vmem:[%s2483_s1 + $0x30] sm:$0xff]  ;;  %v291_v62 = vld [vmem:[%s2483_s1 + $0x38] sm:$0xff] }
  0x28   : > { %535 = vperm.xlu2 %1416, %v356_v25   ;;  %v306_v60 = vld [vmem:[%s2483_s1 + $0xb0] sm:$0xff]  ;;  %v307_v63 = vld [vmem:[%s2483_s1 + $0xb8] sm:$0xff]  ;;  %v377_v0 = vld [vmem:[%s2485_s3 + $0xe8] sm:$0xff] }
  0x29   : > { %387 = vmatpush.msra.mxu0 %v276_v15  ;;  %1348 = vmatpush.msra.mxu3 %v276_v15  ;;  %v374_v61 = vld [vmem:[%s2485_s3 + $0xd0] sm:$0xff]  ;;  %v292_v1 = vld [vmem:[%s2483_s1 + $0x40] sm:$0xff]  ;;  %v293_v3 = vld [vmem:[%s2483_s1 + $0x48] sm:$0xff] }
  0x2a   : > { %v308_v2 = vld [vmem:[%s2483_s1 + $0xc0] sm:$0xff]  ;;  %v309_v4 = vld [vmem:[%s2483_s1 + $0xc8] sm:$0xff]  ;;  %v294_v5 = vld [vmem:[%s2483_s1 + $0x50] sm:$0xff] }
  0x2b   : > { %388 = vmatpush.msra.mxu0 %v275_v16  ;;  %1349 = vmatpush.msra.mxu3 %v275_v16  ;;  %v310_v6 = vld [vmem:[%s2483_s1 + $0xd0] sm:$0xff]  ;;  %v295_v7 = vld [vmem:[%s2483_s1 + $0x58] sm:$0xff]  ;;  %v296_v9 = vld [vmem:[%s2483_s1 + $0x60] sm:$0xff] }
  0x2c   : > { %v311_v8 = vld [vmem:[%s2483_s1 + $0xd8] sm:$0xff]  ;;  %v312_v10 = vld [vmem:[%s2483_s1 + $0xe0] sm:$0xff]  ;;  %v297_v11 = vld [vmem:[%s2483_s1 + $0x68] sm:$0xff] }
  0x2d   : > { %389 = vmatpush.msra.mxu0 %v274_v17  ;;  %1350 = vmatpush.msra.mxu3 %v274_v17  ;;  %v313_v12 = vld [vmem:[%s2483_s1 + $0xe8] sm:$0xff]  ;;  %v298_v13 = vld [vmem:[%s2483_s1 + $0x70] sm:$0xff]  ;;  %v299_v15 = vld [vmem:[%s2483_s1 + $0x78] sm:$0xff] }
  0x2e   : > { %545 = vperm.xlu1 %1415, %v358_v19   ;;  %540 = vperm.xlu0 %1414, %v357_v20   ;;  %v314_v14 = vld [vmem:[%s2483_s1 + $0xf0] sm:$0xff]  ;;  %v315_v16 = vld [vmem:[%s2483_s1 + $0xf8] sm:$0xff] }
  0x2f   : > { %390 = vmatpush.msra.mxu0 %v273_v21  ;;  %1351 = vmatpush.msra.mxu3 %v273_v21 }
  0x30   : > { %550 = vperm.xlu2 %1416, %v359_v32  }
  0x31   : > { %391 = vmatpush.msra.mxu0 %v272_v22  ;;  %1352 = vmatpush.msra.mxu3 %v272_v22 }
  0x33   : > { %392 = vmatpush.msra.mxu0 %v271_v23  ;;  %1353 = vmatpush.msra.mxu3 %v271_v23 }
  0x35   : > { %393 = vmatpush.msra.mxu0 %v270_v24  ;;  %1354 = vmatpush.msra.mxu3 %v270_v24 }
  0x36   : > { %560 = vperm.xlu1 %1415, %v361_v26   ;;  %555 = vperm.xlu0 %1414, %v360_v27  }
  0x37   : > { %394 = vmatpush.msra.mxu0 %v269_v28  ;;  %1355 = vmatpush.msra.mxu3 %v269_v28 }
  0x38   : > { %565 = vperm.xlu2 %1416, %v362_v37  }
  0x39   : > { %395 = vmatpush.msra.mxu0 %v268_v29  ;;  %1356 = vmatpush.msra.mxu3 %v268_v29 }
  0x3a   : > { %396 = vmatmul.f32.vlgmr.msra.gmra.mxu0 %v284_v30  ;;  %444 = vmatmul.f32.vlgmr.msra.gmra.mxu3 %v300_v31 }
  0x3e   : > { %575 = vperm.xlu1 %1415, %v364_v33   ;;  %570 = vperm.xlu0 %1414, %v363_v34  }
  0x40   : > { %580 = vperm.xlu2 %1416, %v365_v42  }
  0x42   : > { %399 = vmatmul.f32.gmra.mxu0 %v285_v35  ;;  %447 = vmatmul.f32.gmra.mxu3 %v301_v36 }
  0x46   : > { %590 = vperm.xlu1 %1415, %v367_v38   ;;  %585 = vperm.xlu0 %1414, %v366_v39  }
  0x48   : > { %595 = vperm.xlu2 %1416, %v368_v51  }
  0x4a   : > { %402 = vmatmul.f32.gmra.mxu0 %v286_v40  ;;  %450 = vmatmul.f32.gmra.mxu3 %v302_v41 }
  0x4e   : > { %605 = vperm.xlu1 %1415, %v370_v43   ;;  %600 = vperm.xlu0 %1414, %v369_v44  }
  0x50   : > { %610 = vperm.xlu2 %1416, %v371_v56  }
  0x52   : > { %405 = vmatmul.f32.gmra.mxu0 %v287_v45  ;;  %453 = vmatmul.f32.gmra.mxu3 %v303_v46 }
  0x56   : > { %620 = vperm.xlu1 %1415, %v373_v47   ;;  %615 = vperm.xlu0 %1414, %v372_v48  }
  0x58   : > { %625 = vperm.xlu2 %1416, %v374_v61  }
  0x5a   : > { %408 = vmatmul.f32.gmra.mxu0 %v288_v49  ;;  %456 = vmatmul.f32.gmra.mxu3 %v304_v50 }
  0x5e   : > { %635 = vperm.xlu1 %1415, %v376_v52   ;;  %630 = vperm.xlu0 %1414, %v375_v53  }
  0x60   : > { %640 = vperm.xlu2 %1416, %v377_v0  }
  0x62   : > { %411 = vmatmul.f32.gmra.mxu0 %v289_v54  ;;  %459 = vmatmul.f32.gmra.mxu3 %v305_v55 }
  0x66   : > { %650 = vperm.xlu1 %1415, %v379_v57   ;;  %645 = vperm.xlu0 %1414, %v378_v58  }
  0x6a   : > { %414 = vmatmul.f32.gmra.mxu0 %v290_v59  ;;  %462 = vmatmul.f32.gmra.mxu3 %v306_v60 }
  0x72   : > { %417 = vmatmul.f32.gmra.mxu0 %v291_v62  ;;  %465 = vmatmul.f32.gmra.mxu3 %v307_v63  ;;  %v516_v27 = vpop.permute.xlu2 %515 }
  0x7a   : > { %420 = vmatmul.f32.gmra.mxu0 %v292_v1  ;;  %468 = vmatmul.f32.gmra.mxu3 %v308_v2  ;;  %v521_v32 = vpop.permute.xlu2 %520 }
  0x82   : > { %423 = vmatmul.f32.gmra.mxu0 %v293_v3  ;;  %471 = vmatmul.f32.gmra.mxu3 %v309_v4  ;;  %v536_v41 = vpop.permute.xlu2 %535 }
  0x88   : > { %v496_v17 = vpop.permute.xlu0 %495  ;;  %v506_v23 = vpop.permute.xlu1 %505 }
  0x8a   : > { %426 = vmatmul.f32.gmra.mxu0 %v294_v5  ;;  %474 = vmatmul.f32.gmra.mxu3 %v310_v6  ;;  %v1834_v49 = vpop.permute.xlu2 %550 }
  0x90   : > { %v1816_v30 = vpop.permute.xlu1 %510  ;;  %v501_v35 = vpop.permute.xlu0 %500 }
  0x92   : > { %429 = vmatmul.f32.gmra.mxu0 %v295_v7  ;;  %477 = vmatmul.f32.gmra.mxu3 %v311_v8  ;;  %v566_v55 = vpop.permute.xlu2 %565 }
  0x98   : > { %v1826_v40 = vpop.permute.xlu1 %530  ;;  %v526_v44 = vpop.permute.xlu0 %525 }
  0x9a   : > { %432 = vmatmul.f32.gmra.mxu0 %v296_v9  ;;  %480 = vmatmul.f32.gmra.mxu3 %v312_v10  ;;  %v581_v61 = vpop.permute.xlu2 %580 }
  0xa0   : > { %v546_v48 = vpop.permute.xlu1 %545  ;;  %v541_v52 = vpop.permute.xlu0 %540 }
  0xa2   : > { %435 = vmatmul.f32.gmra.mxu0 %v297_v11  ;;  %483 = vmatmul.f32.gmra.mxu3 %v313_v12  ;;  %v596_v1 = vpop.permute.xlu2 %595 }
  0xa8   : > { %v561_v53 = vpop.permute.xlu1 %560  ;;  %v556_v57 = vpop.permute.xlu0 %555 }
  0xaa   : > { %438 = vmatmul.f32.gmra.mxu0 %v298_v13  ;;  %486 = vmatmul.f32.gmra.mxu3 %v314_v14  ;;  %v611_v6 = vpop.permute.xlu2 %610 }
  0xb0   : > { %v576_v59 = vpop.permute.xlu1 %575  ;;  %v1840_v62 = vpop.permute.xlu0 %570 }
  0xb2   : > { %441 = vmatmul.f32.gmra.mxu0 %v299_v15  ;;  %489 = vmatmul.f32.gmra.mxu3 %v315_v16 }
  0xb7   : > { %v397_v18 = vpop.f32.mrf.mxu0 }
  0xb8   : > { %v1804_v19 = vsub.f32 %v397_v18, %v496_v17  ;;  %v591_v2 = vpop.permute.xlu1 %590  ;;  %v586_v4 = vpop.permute.xlu0 %585 }
  0xb9   : > { %v626_v17 = vpop.permute.xlu2 %625 }
  0xbd   : > { %v445_v20 = vpop.f32.mrf.mxu3 }
  0xbe   : > { %v1847_v14 = vsub.f32 %v445_v20, %v576_v59 }
  0xbf   : > { %v400_v21 = vpop.f32.mrf.mxu0 }
  0xc0   : > { %v1822_v38 = vsub.f32 %v400_v21, %v501_v35  ;;  %v606_v7 = vpop.permute.xlu1 %605  ;;  %v601_v13 = vpop.permute.xlu0 %600 }
  0xc5   : > { %v1806_v22 = vpop.f32.mrf.mxu3 }
  0xc6   : > { %v1860_v20 = vsub.f32 %v1806_v22, %v581_v61 }
  0xc7   : > { %v403_v24 = vpop.f32.mrf.mxu0 }
  0xc8   : > { %v1808_v25 = vsub.f32 %v403_v24, %v506_v23  ;;  %v621_v23 = vpop.permute.xlu1 %620 }
  0xcd   : > { %v1810_v26 = vpop.f32.mrf.mxu3 }
  0xcf   : > { %v1812_v28 = vpop.f32.mrf.mxu0 }
  0xd5   : > { %v1814_v29 = vpop.f32.mrf.mxu3 }
  0xd7   : > { %v409_v31 = vpop.f32.mrf.mxu0 }
  0xd8   : > { %v1818_v33 = vsub.f32 %v409_v31, %v516_v27 }
  0xda   : > { %v685_v34 = vmax.f32 %v1804_v19, %v1818_v33 }
  0xdd   : > { %v457_v36 = vpop.f32.mrf.mxu3 }
  0xde   : > { %v1850_v16 = vsub.f32 %v457_v36, %v596_v1  ;;  %v616_v36 = vpop.permute.xlu0 %615 }
  0xdf   : > { %v412_v37 = vpop.f32.mrf.mxu0 }
  0xe0   : > { %v1824_v39 = vsub.f32 %v412_v37, %v521_v32 }
  0xe2   : > { %v686_v42 = vmax.f32 %v1822_v38, %v1824_v39 }
  0xe5   : > { %v460_v43 = vpop.f32.mrf.mxu3 }
  0xe7   : > { %v415_v45 = vpop.f32.mrf.mxu0 }
  0xe8   : > { %v1830_v46 = vsub.f32 %v415_v45, %v526_v44 }
  0xea   : > { %v687_v47 = vmax.f32 %v1808_v25, %v1830_v46 }
  0xed   : > { %v1836_v50 = vpop.f32.mrf.mxu3 }
  0xef   : > { %v418_v51 = vpop.f32.mrf.mxu0 }
  0xf5   : > { %v1838_v54 = vpop.f32.mrf.mxu3 }
  0xf7   : > { %v421_v56 = vpop.f32.mrf.mxu0 }
  0xf8   : > { %v1842_v8 = vsub.f32 %v421_v56, %v536_v41  ;;  %v1865_v41 = vsub.f32 %v460_v43, %v601_v13  ;;  %v641_v56 = vpop.permute.xlu2 %640  ;;  %v1896_v13 = vsub.f32 %v1836_v50, %v606_v7  ;;  %v1910_v50 = vsub.f32 %v1814_v29, %v591_v2 }
  0xfa   : > { %v689_v11 = vmax.f32 %v685_v34, %v1842_v8 }
  0xfd   : > { %v469_v58 = vpop.f32.mrf.mxu3 }
  0xfe   : > { %v1867_v44 = vsub.f32 %v469_v58, %v616_v36 }
  0xff   : > { %v424_v60 = vpop.f32.mrf.mxu0 }
 0x100   : > { %v1852_v18 = vsub.f32 %v424_v60, %v541_v52 }
 0x102   : > { %v690_v32 = vmax.f32 %v686_v42, %v1852_v18 }
 0x105   : > { %v472_v63 = vpop.f32.mrf.mxu3 }
 0x107   : > { %v427_v0 = vpop.f32.mrf.mxu0 }
 0x108   : > { %v1863_v37 = vsub.f32 %v427_v0, %v546_v48  ;;  %v1883_v0 = vsub.f32 %v1810_v26, %v586_v4 }
 0x10a   : > { %v691_v59 = vmax.f32 %v687_v47, %v1863_v37 }
 0x10d   : > { %v475_v3 = vpop.f32.mrf.mxu3 }
 0x10e   : > { %v1916_v7 = vsub.f32 %v475_v3, %v626_v17 }
 0x10f   : > { %v430_v5 = vpop.f32.mrf.mxu0 }
 0x115   : > { %v478_v9 = vpop.f32.mrf.mxu3 }
 0x117   : > { %v433_v10 = vpop.f32.mrf.mxu0 }
 0x118   : > { %v1845_v12 = vsub.f32 %v433_v10, %v556_v57  ;;  %v1870_v57 = vsub.f32 %v472_v63, %v621_v23  ;;  %v1886_v63 = vsub.f32 %v418_v51, %v1826_v40  ;;  %v631_v51 = vpop.permute.xlu0 %630 }
 0x11a   : > { %v693_v15 = vmax.f32 %v689_v11, %v1845_v12  ;;  %v1893_v11 = vsub.f32 %v1812_v28, %v1816_v30 }
 0x11c   : > { %v697_v21 = vmax.f32 %v693_v15, %v1847_v14  ;;  %v688_v15 = vmax.f32 %v1893_v11, %v1886_v63 }
 0x11d   : > { %v481_v24 = vpop.f32.mrf.mxu3 }
 0x11e   : > { %v701_v27 = vmax.f32 %v697_v21, %v1850_v16 }
 0x11f   : > { %v436_v31 = vpop.f32.mrf.mxu0 }
 0x120   : > { %v1857_v34 = vsub.f32 %v436_v31, %v561_v53  ;;  %v705_v42 = vmax.f32 %v701_v27, %v1867_v44  ;;  %v636_v53 = vpop.permute.xlu1 %635  ;;  %v1919_v31 = vsub.f32 %v478_v9, %v631_v51  ;;  %v646_v36 = vpop.permute.xlu0 %645 }
 0x121   : > { %v1875_v48 = vsub.f32 %v481_v24, %v636_v53 }
 0x122   : > { %v694_v35 = vmax.f32 %v690_v32, %v1857_v34 }
 0x123   : > { %v709_v1 = vmax.f32 %v705_v42, %v1875_v48 }
 0x124   : > { %v698_v45 = vmax.f32 %v694_v35, %v1860_v20 }
 0x125   : > { %v484_v52 = vpop.f32.mrf.mxu3 }
 0x126   : > { %v702_v22 = vmax.f32 %v698_v45, %v1865_v41  ;;  %v1877_v43 = vsub.f32 %v484_v52, %v641_v56 }
 0x127   : > { %v439_v60 = vpop.f32.mrf.mxu0 }
 0x128   : > { %v706_v58 = vmax.f32 %v702_v22, %v1870_v57  ;;  %v1880_v61 = vsub.f32 %v439_v60, %v566_v55  ;;  %v1899_v55 = vsub.f32 %v430_v5, %v1834_v49  ;;  %v1914_v5 = vsub.f32 %v1838_v54, %v611_v6  ;;  %v651_v35 = vpop.permute.xlu1 %650 }
 0x129   : > { %v722_v6 = vlaneseq }
 0x12a   : > { %v710_v10 = vmax.f32 %v706_v58, %v1877_v43  ;;  %v695_v47 = vmax.f32 %v691_v59, %v1880_v61  ;;  %v692_v28 = vmax.f32 %v688_v15, %v1899_v55 }
 0x12b   : > { %v1927_v56 = vshrl.u32 %v722_v6, 7 }
 0x12c   : > { %v713_v26 = vmax.f32 %v709_v1, %v710_v10  ;;  %v699_v40 = vmax.f32 %v695_v47, %v1883_v0 }
 0x12d   : > { %v487_v4 = vpop.f32.mrf.mxu3  ;;  %v1930_v22 = vadd.s32 128, %v1927_v56  ;;  %v1933_v53 = vadd.s32 8, %v1927_v56  ;;  %v1936_v59 = vadd.s32 136, %v1927_v56  ;;  %v1939_v60 = vadd.s32 16, %v1927_v56 }
 0x12e   : > { %v703_v21 = vmax.f32 %v699_v40, %v1896_v13  ;;  %v1923_v29 = vsub.f32 %v487_v4, %v646_v36  ;;  %v1942_v58 = vadd.s32 144, %v1927_v56  ;;  %v1945_v1 = vadd.s32 24, %v1927_v56 }
 0x12f   : > { %v442_v23 = vpop.f32.mrf.mxu0  ;;  %2506 = vst [vmem:[#allocation5_spill] sm:$0xff] %v1930_v22  ;;  %v1948_v47 = vadd.s32 152, %v1927_v56  ;;  %v1954_v40 = vadd.s32 160, %v1927_v56  ;;  %v1957_v51 = vadd.s32 40, %v1927_v56  ;;  %v1960_v4 = vadd.s32 168, %v1927_v56 }
 0x130   : > { %v1907_v30 = vsub.f32 %v442_v23, %v1840_v62  ;;  %v707_v32 = vmax.f32 %v703_v21, %v1916_v7  ;;  %2507 = vst [vmem:[#allocation6_spill] sm:$0xff] %v1933_v53  ;;  %v1963_v15 = vadd.s32 48, %v1927_v56  ;;  %v1966_v21 = vadd.s32 176, %v1927_v56 }
 0x131   : > { %2508 = vst [vmem:[#allocation7_spill] sm:$0xff] %v1936_v59  ;;  %v1999_v6 = vadd.s32 248, %v1927_v56 }
 0x132   : > { %v696_v49 = vmax.f32 %v692_v28, %v1907_v30  ;;  %v711_v54 = vmax.f32 %v707_v32, %v1923_v29  ;;  %2509 = vst [vmem:[#allocation8_spill] sm:$0xff] %v1939_v60  ;;  %v1969_v28 = vadd.s32 56, %v1927_v56  ;;  %v1981_v32 = vadd.s32 72, %v1927_v56 }
 0x133   : > { %2510 = vst [vmem:[#allocation9_spill] sm:$0xff] %v1942_v58 }
 0x134   : > { %v700_v24 = vmax.f32 %v696_v49, %v1910_v50  ;;  %2511 = vst [vmem:[#allocation10_spill] sm:$0xff] %v1945_v1  ;;  %v1972_v49 = vadd.s32 184, %v1927_v56 }
 0x135   : > { %v490_v27 = vpop.f32.mrf.mxu3  ;;  %2512 = vst [vmem:[#allocation11_spill] sm:$0xff] %v1948_v47 }
 0x136   : > { %v704_v62 = vmax.f32 %v700_v24, %v1914_v5  ;;  %v684_v2 = vsub.f32 %v490_v27, %v651_v35  ;;  %2514 = vst [vmem:[#allocation13_spill] sm:$0xff] %v1954_v40  ;;  %v1975_v24 = vadd.s32 64, %v1927_v56  ;;  %v1978_v27 = vadd.s32 192, %v1927_v56 }
 0x137   : > { %2515 = vst [vmem:[#allocation14_spill] sm:$0xff] %v1960_v4  ;;  %v1987_v35 = vadd.s32 80, %v1927_v56 }
 0x138   : > { %v708_v45 = vmax.f32 %v704_v62, %v1919_v31  ;;  %v1984_v62 = vadd.s32 200, %v1927_v56  ;;  %2519 = vst [vmem:[#allocation18_spill] sm:$0xff] %v1999_v6 }
 0x13a   : > { %v712_v3 = vmax.f32 %v708_v45, %v684_v2  ;;  %2516 = vst [vmem:[#allocation15_spill] sm:$0xff] %v1984_v62  ;;  %v1990_v45 = vadd.s32 208, %v1927_v56  ;;  %v2022_v62 = vadd.s32 120, %v1927_v56 }
 0x13c   : > { %v714_v17 = vmax.f32 %v711_v54, %v712_v3  ;;  %2517 = vst [vmem:[#allocation16_spill] sm:$0xff] %v1990_v45  ;;  %v1993_v54 = vadd.s32 88, %v1927_v56  ;;  %v1996_v3 = vadd.s32 216, %v1927_v56  ;;  %v2016_v45 = vadd.s32 112, %v1927_v56 }
 0x13e   : > { %v715_v52 = vmax.f32 %v713_v26, %v714_v17  ;;  %v1951_v26 = vadd.s32 32, %v1927_v56  ;;  %2518 = vst [vmem:[#allocation17_spill] sm:$0xff] %v1996_v3  ;;  %v2002_v17 = vadd.s32 96, %v1927_v56  ;;  %v2019_v3 = vadd.s32 240, %v1927_v56 }
 0x140   : > { %v716_v9 = vrot.slane %v715_v52, 4  ;;  %2513 = vst [vmem:[#allocation12_spill] sm:$0xff] %v1951_v26 }
 0x142   : > { %v717_v42 = vmax.f32 %v715_v52, %v716_v9  ;;  %v2005_v52 = vadd.s32 224, %v1927_v56  ;;  %v2008_v9 = vadd.s32 104, %v1927_v56 }
 0x144   : > { %v718_v10 = vrot.slane %v717_v42, 2 }
 0x146   : > { %v719_v23 = vmax.f32 %v717_v42, %v718_v10  ;;  %v2013_v10 = vadd.s32 232, %v1927_v56 }
 0x148   : > { %v720_v36 = vrot.slane %v719_v23, 1 }
 0x14a   : > { %v2010_v42 = vmax.f32 %v719_v23, %v720_v36 }
 0x14c   : > { %vm786_vm0 = vcmp.eq.f32.partialorder %v684_v2, %v2010_v42  ;;  %vm755_vm1 = vcmp.eq.f32.partialorder %v1804_v19, %v2010_v42  ;;  %vm756_vm2 = vcmp.eq.f32.partialorder %v1822_v38, %v2010_v42  ;;  %vm757_vm3 = vcmp.eq.f32.partialorder %v1808_v25, %v2010_v42 }
 0x14d   : > { %v2032_v23 = vsel %vm786_vm0, %v1999_v6, 256  ;;  %vm758_vm4 = vcmp.eq.f32.partialorder %v1893_v11, %v2010_v42  ;;  %vm759_vm5 = vcmp.eq.f32.partialorder %v1818_v33, %v2010_v42  ;;  %vm760_vm6 = vcmp.eq.f32.partialorder %v1824_v39, %v2010_v42 }
 0x14e   : > { %2520 = vst [vmem:[#allocation19_spill] sm:$0xff] %v2032_v23  ;;  %vm761_vm7 = vcmp.eq.f32.partialorder %v1830_v46, %v2010_v42  ;;  %vm762_vm8 = vcmp.eq.f32.partialorder %v1886_v63, %v2010_v42  ;;  %vm763_vm9 = vcmp.eq.f32.partialorder %v1842_v8, %v2010_v42  ;;  %vm779_vm11 = vcmp.eq.f32.partialorder %v1867_v44, %v2010_v42 }
 0x14f   : > { %vm780_vm12 = vcmp.eq.f32.partialorder %v1870_v57, %v2010_v42  ;;  %vm781_vm13 = vcmp.eq.f32.partialorder %v1916_v7, %v2010_v42  ;;  %vm782_vm14 = vcmp.eq.f32.partialorder %v1919_v31, %v2010_v42  ;;  %vm783_vm15 = vcmp.eq.f32.partialorder %v1875_v48, %v2010_v42 }
 0x150   : > { %vm784_vm0 = vcmp.eq.f32.partialorder %v1877_v43, %v2010_v42  ;;  %vm785_vm10 = vcmp.eq.f32.partialorder %v1923_v29, %v2010_v42  ;;  %v787_v2 = vsel %vm755_vm1, %v1927_v56, 256  ;;  %v788_v36 = vsel %vm756_vm2, %v1933_v53, 256  ;;  %v2538_v53 = vld [vmem:[#allocation17_spill] sm:$0xff] }
 0x151   : > { %v789_v6 = vsel %vm757_vm3, %v1939_v60, 256  ;;  %v790_v23 = vsel %vm758_vm4, %v1945_v1, 256  ;;  %v791_v19 = vsel %vm759_vm5, %v1951_v26, 256  ;;  %v792_v38 = vsel %vm760_vm6, %v1957_v51, 256 }
 0x152   : > { %v793_v25 = vsel %vm761_vm7, %v1963_v15, 256  ;;  %v794_v11 = vsel %vm762_vm8, %v1969_v28, 256  ;;  %v795_v33 = vsel %vm763_vm9, %v1975_v24, 256  ;;  %vm2521_vm1 = vcmp.eq.f32.partialorder %v1852_v18, %v2010_v42 }
 0x153   : > { %v796_v39 = vsel %vm2521_vm1, %v1981_v32, 256  ;;  %vm2522_vm2 = vcmp.eq.f32.partialorder %v1863_v37, %v2010_v42  ;;  %vm2523_vm3 = vcmp.eq.f32.partialorder %v1899_v55, %v2010_v42  ;;  %vm2524_vm4 = vcmp.eq.f32.partialorder %v1845_v12, %v2010_v42 }
 0x154   : > { %v797_v46 = vsel %vm2522_vm2, %v1987_v35, 256  ;;  %v798_v63 = vsel %vm2523_vm3, %v1993_v54, 256  ;;  %v799_v8 = vsel %vm2524_vm4, %v2002_v17, 256  ;;  %vm2525_vm5 = vcmp.eq.f32.partialorder %v1857_v34, %v2010_v42 }
 0x155   : > { %v800_v18 = vsel %vm2525_vm5, %v2008_v9, 256  ;;  %vm2526_vm6 = vcmp.eq.f32.partialorder %v1880_v61, %v2010_v42  ;;  %vm2527_vm7 = vcmp.eq.f32.partialorder %v1907_v30, %v2010_v42  ;;  %vm2528_vm8 = vcmp.eq.f32.partialorder %v1847_v14, %v2010_v42 }
 0x156   : > { %v801_v37 = vsel %vm2526_vm6, %v2016_v45, 256  ;;  %v802_v55 = vsel %vm2527_vm7, %v2022_v62, 256  ;;  %v803_v12 = vsel %vm2528_vm8, %v1930_v22, 256  ;;  %vm2529_vm9 = vcmp.eq.f32.partialorder %v1860_v20, %v2010_v42  ;;  %v2536_v22 = vld [vmem:[#allocation15_spill] sm:$0xff] }
 0x157   : > { %v804_v34 = vsel %vm2529_vm9, %v1936_v59, 256  ;;  %vm2530_vm1 = vcmp.eq.f32.partialorder %v1883_v0, %v2010_v42  ;;  %vm2531_vm2 = vcmp.eq.f32.partialorder %v1910_v50, %v2010_v42  ;;  %vm2532_vm3 = vcmp.eq.f32.partialorder %v1850_v16, %v2010_v42  ;;  %v2537_v59 = vld [vmem:[#allocation16_spill] sm:$0xff] }
 0x158   : > { %v805_v61 = vsel %vm2530_vm1, %v1942_v58, 256  ;;  %v806_v30 = vsel %vm2531_vm2, %v1948_v47, 256  ;;  %v807_v14 = vsel %vm2532_vm3, %v1954_v40, 256  ;;  %vm2533_vm4 = vcmp.eq.f32.partialorder %v1865_v41, %v2010_v42 }
 0x159   : > { %v808_v20 = vsel %vm2533_vm4, %v1960_v4, 256  ;;  %vm2534_vm5 = vcmp.eq.f32.partialorder %v1896_v13, %v2010_v42  ;;  %vm2535_vm6 = vcmp.eq.f32.partialorder %v1914_v5, %v2010_v42  ;;  %v811_v16 = vsel %vm779_vm11, %v1978_v27, 256 }
 0x15a   : > { %v809_v0 = vsel %vm2534_vm5, %v1966_v21, 256  ;;  %v810_v50 = vsel %vm2535_vm6, %v1972_v49, 256  ;;  %v812_v41 = vsel %vm780_vm12, %v2536_v22, 256  ;;  %v813_v13 = vsel %vm781_vm13, %v2537_v59, 256 }
 0x15b   : > { %v814_v5 = vsel %vm782_vm14, %v2538_v53, 256  ;;  %v815_v44 = vsel %vm783_vm15, %v2005_v52, 256  ;;  %v816_v57 = vsel %vm784_vm0, %v2013_v10, 256  ;;  %v817_v7 = vsel %vm785_vm10, %v2019_v3, 256 }
 0x15c   : > { %vm819_vm11 = vcmp.lt.s32.totalorder %v787_v2, %v791_v19  ;;  %vm821_vm12 = vcmp.lt.s32.totalorder %v788_v36, %v792_v38  ;;  %vm823_vm13 = vcmp.lt.s32.totalorder %v789_v6, %v793_v25  ;;  %vm825_vm7 = vcmp.lt.s32.totalorder %v790_v23, %v794_v11 }
 0x15d   : > { %v820_v31 = vsel %vm819_vm11, %v787_v2, %v791_v19  ;;  %v822_v58 = vsel %vm821_vm12, %v788_v36, %v792_v38  ;;  %v824_v60 = vsel %vm823_vm13, %v789_v6, %v793_v25  ;;  %v826_v47 = vsel %vm825_vm7, %v790_v23, %v794_v11 }
 0x15e   : > { %vm827_vm14 = vcmp.lt.s32.totalorder %v820_v31, %v795_v33  ;;  %vm829_vm15 = vcmp.lt.s32.totalorder %v822_v58, %v796_v39  ;;  %vm831_vm8 = vcmp.lt.s32.totalorder %v824_v60, %v797_v46  ;;  %vm833_vm9 = vcmp.lt.s32.totalorder %v826_v47, %v798_v63 }
 0x15f   : > { %v828_v48 = vsel %vm827_vm14, %v820_v31, %v795_v33  ;;  %v830_v43 = vsel %vm829_vm15, %v822_v58, %v796_v39  ;;  %v832_v1 = vsel %vm831_vm8, %v824_v60, %v797_v46  ;;  %v834_v40 = vsel %vm833_vm9, %v826_v47, %v798_v63  ;;  %v336_v31 = vld [vmem:[%s2484_s2 + $0xa0] sm:$0xff] }
 0x160   : > { %vm835_vm0 = vcmp.lt.s32.totalorder %v828_v48, %v799_v8  ;;  %vm837_vm1 = vcmp.lt.s32.totalorder %v830_v43, %v800_v18  ;;  %vm839_vm2 = vcmp.lt.s32.totalorder %v832_v1, %v801_v37  ;;  %vm841_vm10 = vcmp.lt.s32.totalorder %v834_v40, %v802_v55 }
 0x161   : > { %v836_v29 = vsel %vm835_vm0, %v828_v48, %v799_v8  ;;  %v838_v42 = vsel %vm837_vm1, %v830_v43, %v800_v18  ;;  %v840_v26 = vsel %vm839_vm2, %v832_v1, %v801_v37  ;;  %v842_v4 = vsel %vm841_vm10, %v834_v40, %v802_v55  ;;  %v339_v48 = vld [vmem:[%s2484_s2 + $0xb8] sm:$0xff]  ;;  %v338_v43 = vld [vmem:[%s2484_s2 + $0xb0] sm:$0xff] }
 0x162   : > { %vm843_vm3 = vcmp.lt.s32.totalorder %v836_v29, %v803_v12  ;;  %vm845_vm4 = vcmp.lt.s32.totalorder %v838_v42, %v804_v34  ;;  %vm847_vm5 = vcmp.lt.s32.totalorder %v840_v26, %v805_v61  ;;  %vm849_vm6 = vcmp.lt.s32.totalorder %v842_v4, %v806_v30 }
 0x163   : > { %v844_v6 = vsel %vm843_vm3, %v836_v29, %v803_v12  ;;  %v846_v23 = vsel %vm845_vm4, %v838_v42, %v804_v34  ;;  %v848_v2 = vsel %vm847_vm5, %v840_v26, %v805_v61  ;;  %v850_v36 = vsel %vm849_vm6, %v842_v4, %v806_v30  ;;  %v2539_v26 = vld [vmem:[#allocation19_spill] sm:$0xff]  ;;  %v2540_v30 = vld [vmem:[#allocation18_spill] sm:$0xff]  ;;  %v340_v42 = vld [vmem:[%s2484_s2 + $0xc0] sm:$0xff] }
 0x164   : > { %vm851_vm11 = vcmp.lt.s32.totalorder %v844_v6, %v807_v14  ;;  %vm853_vm12 = vcmp.lt.s32.totalorder %v846_v23, %v808_v20  ;;  %vm855_vm13 = vcmp.lt.s32.totalorder %v848_v2, %v809_v0  ;;  %vm857_vm7 = vcmp.lt.s32.totalorder %v850_v36, %v810_v50  ;;  %v341_v29 = vld [vmem:[%s2484_s2 + $0xc8] sm:$0xff] }
 0x165   : > { %v852_v60 = vsel %vm851_vm11, %v844_v6, %v807_v14  ;;  %v854_v58 = vsel %vm853_vm12, %v846_v23, %v808_v20  ;;  %v856_v47 = vsel %vm855_vm13, %v848_v2, %v809_v0  ;;  %v858_v19 = vsel %vm857_vm7, %v850_v36, %v810_v50  ;;  %v326_v20 = vld [vmem:[%s2484_s2 + $0x50] sm:$0xff]  ;;  %v329_v0 = vld [vmem:[%s2484_s2 + $0x68] sm:$0xff]  ;;  %v328_v50 = vld [vmem:[%s2484_s2 + $0x60] sm:$0xff] }
 0x166   : > { %vm859_vm14 = vcmp.lt.s32.totalorder %v852_v60, %v811_v16  ;;  %vm861_vm15 = vcmp.lt.s32.totalorder %v854_v58, %v812_v41  ;;  %vm863_vm8 = vcmp.lt.s32.totalorder %v856_v47, %v813_v13  ;;  %vm865_vm9 = vcmp.lt.s32.totalorder %v858_v19, %v814_v5  ;;  %v343_v6 = vld [vmem:[%s2484_s2 + $0xd8] sm:$0xff]  ;;  %v342_v23 = vld [vmem:[%s2484_s2 + $0xd0] sm:$0xff]  ;;  %v345_v2 = vld [vmem:[%s2484_s2 + $0xe8] sm:$0xff] }
 0x167   : > { %v860_v1 = vsel %vm859_vm14, %v852_v60, %v811_v16  ;;  %v862_v40 = vsel %vm861_vm15, %v854_v58, %v812_v41  ;;  %v864_v38 = vsel %vm863_vm8, %v856_v47, %v813_v13  ;;  %v866_v25 = vsel %vm865_vm9, %v858_v19, %v814_v5  ;;  %v331_v16 = vld [vmem:[%s2484_s2 + $0x78] sm:$0xff]  ;;  %v330_v41 = vld [vmem:[%s2484_s2 + $0x70] sm:$0xff]  ;;  %v333_v13 = vld [vmem:[%s2484_s2 + $0x88] sm:$0xff] }
 0x168   : > { %vm867_vm0 = vcmp.lt.s32.totalorder %v860_v1, %v815_v44  ;;  %vm869_vm1 = vcmp.lt.s32.totalorder %v862_v40, %v816_v57  ;;  %vm871_vm2 = vcmp.lt.s32.totalorder %v864_v38, %v817_v7  ;;  %vm873_vm10 = vcmp.lt.s32.totalorder %v866_v25, %v2539_v26  ;;  %v332_v5 = vld [vmem:[%s2484_s2 + $0x80] sm:$0xff]  ;;  %v347_v60 = vld [vmem:[%s2484_s2 + $0xf8] sm:$0xff]  ;;  %v346_v58 = vld [vmem:[%s2484_s2 + $0xf0] sm:$0xff] }
 0x169   : > { %v868_v4 = vsel %vm867_vm0, %v860_v1, %v815_v44  ;;  %v870_v11 = vsel %vm869_vm1, %v862_v40, %v816_v57  ;;  %v872_v33 = vsel %vm871_vm2, %v864_v38, %v817_v7  ;;  %v874_v39 = vsel %vm873_vm10, %v866_v25, %v2539_v26  ;;  %v335_v44 = vld [vmem:[%s2484_s2 + $0x98] sm:$0xff]  ;;  %v334_v57 = vld [vmem:[%s2484_s2 + $0x90] sm:$0xff]  ;;  %v337_v7 = vld [vmem:[%s2484_s2 + $0xa8] sm:$0xff] }
 0x16a   : > { %vm875_vm3 = vcmp.lt.s32.totalorder %v868_v4, %v870_v11  ;;  %vm877_vm4 = vcmp.lt.s32.totalorder %v872_v33, %v874_v39  ;;  %v1498_v14 = vmov 1.0   ;;  %v344_v36 = vld [vmem:[%s2484_s2 + $0xe0] sm:$0xff] }
 0x16b   : > { %v876_v46 = vsel %vm875_vm3, %v868_v4, %v870_v11  ;;  %v878_v63 = vsel %vm877_vm4, %v872_v33, %v874_v39 }
 0x16c   : > { %vm879_vm5 = vcmp.lt.s32.totalorder %v876_v46, %v878_v63 }
 0x16d   : > { %v880_v8 = vsel %vm879_vm5, %v876_v46, %v878_v63 }
 0x16e   : > { %v881_v18 = vrot.slane %v880_v8, 4 }
 0x170   : > { %vm882_vm6 = vcmp.lt.s32.totalorder %v880_v8, %v881_v18 }
 0x171   : > { %v883_v37 = vsel %vm882_vm6, %v880_v8, %v881_v18 }
 0x172   : > { %v884_v55 = vrot.slane %v883_v37, 2 }
 0x174   : > { %vm885_vm11 = vcmp.lt.s32.totalorder %v883_v37, %v884_v55 }
 0x175   : > { %v886_v12 = vsel %vm885_vm11, %v883_v37, %v884_v55 }
 0x176   : > { %v887_v34 = vrot.slane %v886_v12, 1 }
 0x178   : > { %vm888_vm12 = vcmp.lt.s32.totalorder %v886_v12, %v887_v34 }
 0x179   : > { %v2217_v61 = vsel %vm888_vm12, %v886_v12, %v887_v34 }
 0x17a   : > { %vm906_vm13 = vcmp.eq.s32.totalorder %v2022_v62, %v2217_v61  ;;  %vm922_vm7 = vcmp.eq.s32.totalorder %v2540_v30, %v2217_v61  ;;  %890 = vst [vmem:[%s2225_s10] sm:$0x1] %v2217_v61  ;;  %vm905_vm14 = vcmp.eq.s32.totalorder %v2016_v45, %v2217_v61  ;;  %vm921_vm15 = vcmp.eq.s32.totalorder %v2019_v3, %v2217_v61  ;;  %v2550_v62 = vld [vmem:[#allocation5_spill] sm:$0xff]  ;;  %v318_v45 = vld [vmem:[%s2484_s2 + $0x10] sm:$0xff]  ;;  %v323_v3 = vld [vmem:[%s2484_s2 + $0x38] sm:$0xff] }
 0x17b   : > { %1305 = vmatpush.msk.msra.mxu1 %vm906_vm13, %v1498_v14  ;;  %1321 = vmatpush.msk.msra.mxu2 %vm922_vm7, %v1498_v14  ;;  %vm904_vm8 = vcmp.eq.s32.totalorder %v2008_v9, %v2217_v61  ;;  %vm920_vm9 = vcmp.eq.s32.totalorder %v2013_v10, %v2217_v61  ;;  %vm903_vm0 = vcmp.eq.s32.totalorder %v2002_v17, %v2217_v61  ;;  %v322_v17 = vld [vmem:[%s2484_s2 + $0x30] sm:$0xff]  ;;  %v324_v9 = vld [vmem:[%s2484_s2 + $0x40] sm:$0xff]  ;;  %v327_v10 = vld [vmem:[%s2484_s2 + $0x58] sm:$0xff] }
 0x17c   : > { %vm919_vm1 = vcmp.eq.s32.totalorder %v2005_v52, %v2217_v61  ;;  %vm902_vm2 = vcmp.eq.s32.totalorder %v1993_v54, %v2217_v61  ;;  %vm918_vm10 = vcmp.eq.s32.totalorder %v2538_v53, %v2217_v61  ;;  %vm891_vm3 = vcmp.eq.s32.totalorder %v1927_v56, %v2217_v61  ;;  %v2542_v53 = vld [vmem:[#allocation12_spill] sm:$0xff]  ;;  %v321_v54 = vld [vmem:[%s2484_s2 + $0x28] sm:$0xff] }
 0x17d   : > { %1306 = vmatpush.msk.msra.mxu1 %vm905_vm14, %v1498_v14  ;;  %1322 = vmatpush.msk.msra.mxu2 %vm921_vm15, %v1498_v14  ;;  %vm901_vm4 = vcmp.eq.s32.totalorder %v1987_v35, %v2217_v61  ;;  %vm917_vm5 = vcmp.eq.s32.totalorder %v2537_v59, %v2217_v61  ;;  %vm900_vm6 = vcmp.eq.s32.totalorder %v1981_v32, %v2217_v61  ;;  %v2543_v59 = vld [vmem:[#allocation13_spill] sm:$0xff]  ;;  %v319_v35 = vld [vmem:[%s2484_s2 + $0x18] sm:$0xff] }
 0x17e   : > { %vm916_vm11 = vcmp.eq.s32.totalorder %v2536_v22, %v2217_v61  ;;  %vm899_vm12 = vcmp.eq.s32.totalorder %v1975_v24, %v2217_v61  ;;  %vm915_vm13 = vcmp.eq.s32.totalorder %v1978_v27, %v2217_v61  ;;  %vm898_vm7 = vcmp.eq.s32.totalorder %v1969_v28, %v2217_v61  ;;  %v2541_v22 = vld [vmem:[#allocation14_spill] sm:$0xff]  ;;  %v2547_v28 = vld [vmem:[#allocation9_spill] sm:$0xff]  ;;  %v2549_v24 = vld [vmem:[#allocation7_spill] sm:$0xff] }
 0x17f   : > { %1307 = vmatpush.msk.msra.mxu1 %vm904_vm8, %v1498_v14  ;;  %1323 = vmatpush.msk.msra.mxu2 %vm920_vm9, %v1498_v14  ;;  %vm914_vm14 = vcmp.eq.s32.totalorder %v1972_v49, %v2217_v61  ;;  %vm897_vm15 = vcmp.eq.s32.totalorder %v1963_v15, %v2217_v61  ;;  %vm913_vm8 = vcmp.eq.s32.totalorder %v1966_v21, %v2217_v61  ;;  %v2544_v15 = vld [vmem:[#allocation10_spill] sm:$0xff]  ;;  %v2546_v21 = vld [vmem:[#allocation8_spill] sm:$0xff] }
 0x180   : > { %vm896_vm9 = vcmp.eq.s32.totalorder %v1957_v51, %v2217_v61  ;;  %v2545_v51 = vld [vmem:[#allocation11_spill] sm:$0xff]  ;;  %v2548_v49 = vld [vmem:[#allocation6_spill] sm:$0xff]  ;;  %v316_v32 = vld [vmem:[%s2484_s2] sm:$0xff] }
 0x181   : > { %1308 = vmatpush.msk.msra.mxu1 %vm903_vm0, %v1498_v14  ;;  %1324 = vmatpush.msk.msra.mxu2 %vm919_vm1, %v1498_v14  ;;  %vm912_vm0 = vcmp.eq.s32.totalorder %v2541_v22, %v2217_v61  ;;  %vm895_vm1 = vcmp.eq.s32.totalorder %v2542_v53, %v2217_v61  ;;  %v317_v27 = vld [vmem:[%s2484_s2 + $0x8] sm:$0xff]  ;;  %v320_v56 = vld [vmem:[%s2484_s2 + $0x20] sm:$0xff] }
 0x182   : > { %v325_v52 = vld [vmem:[%s2484_s2 + $0x48] sm:$0xff] }
 0x183   : > { %1309 = vmatpush.msk.msra.mxu1 %vm902_vm2, %v1498_v14  ;;  %1325 = vmatpush.msk.msra.mxu2 %vm918_vm10, %v1498_v14  ;;  %vm911_vm2 = vcmp.eq.s32.totalorder %v2543_v59, %v2217_v61  ;;  %vm894_vm10 = vcmp.eq.s32.totalorder %v2544_v15, %v2217_v61 }
 0x185   : > { %1310 = vmatpush.msk.msra.mxu1 %vm901_vm4, %v1498_v14  ;;  %1326 = vmatpush.msk.msra.mxu2 %vm917_vm5, %v1498_v14  ;;  %vm910_vm4 = vcmp.eq.s32.totalorder %v2545_v51, %v2217_v61  ;;  %vm893_vm5 = vcmp.eq.s32.totalorder %v2546_v21, %v2217_v61 }
 0x187   : > { %1311 = vmatpush.msk.msra.mxu1 %vm900_vm6, %v1498_v14  ;;  %1327 = vmatpush.msk.msra.mxu2 %vm916_vm11, %v1498_v14  ;;  %vm909_vm6 = vcmp.eq.s32.totalorder %v2547_v28, %v2217_v61  ;;  %vm892_vm11 = vcmp.eq.s32.totalorder %v2548_v49, %v2217_v61 }
 0x189   : > { %1312 = vmatpush.msk.msra.mxu1 %vm899_vm12, %v1498_v14  ;;  %1328 = vmatpush.msk.msra.mxu2 %vm915_vm13, %v1498_v14  ;;  %vm908_vm12 = vcmp.eq.s32.totalorder %v2549_v24, %v2217_v61  ;;  %vm907_vm13 = vcmp.eq.s32.totalorder %v2550_v62, %v2217_v61 }
 0x18b   : > { %1313 = vmatpush.msk.msra.mxu1 %vm898_vm7, %v1498_v14  ;;  %1329 = vmatpush.msk.msra.mxu2 %vm914_vm14, %v1498_v14 }
 0x18d   : > { %1314 = vmatpush.msk.msra.mxu1 %vm897_vm15, %v1498_v14  ;;  %1330 = vmatpush.msk.msra.mxu2 %vm913_vm8, %v1498_v14 }
 0x18f   : > { %1315 = vmatpush.msk.msra.mxu1 %vm896_vm9, %v1498_v14  ;;  %1331 = vmatpush.msk.msra.mxu2 %vm912_vm0, %v1498_v14 }
 0x191   : > { %1316 = vmatpush.msk.msra.mxu1 %vm895_vm1, %v1498_v14  ;;  %1332 = vmatpush.msk.msra.mxu2 %vm911_vm2, %v1498_v14 }
 0x193   : > { %1317 = vmatpush.msk.msra.mxu1 %vm894_vm10, %v1498_v14  ;;  %1333 = vmatpush.msk.msra.mxu2 %vm910_vm4, %v1498_v14 }
 0x195   : > { %1318 = vmatpush.msk.msra.mxu1 %vm893_vm5, %v1498_v14  ;;  %1334 = vmatpush.msk.msra.mxu2 %vm909_vm6, %v1498_v14 }
 0x197   : > { %1319 = vmatpush.msk.msra.mxu1 %vm892_vm11, %v1498_v14  ;;  %1335 = vmatpush.msk.msra.mxu2 %vm908_vm12, %v1498_v14 }
 0x199   : > { %1320 = vmatpush.msk.msra.mxu1 %vm891_vm3, %v1498_v14  ;;  %1336 = vmatpush.msk.msra.mxu2 %vm907_vm13, %v1498_v14 }
 0x19a   : > { %1068 = vmatmul.f32.vlgmr.msra.gmra.mxu2 %v317_v27  ;;  %1003 = vmatmul.f32.vlgmr.msra.gmra.mxu1 %v316_v32 }
 0x1a2   : > { %1071 = vmatmul.f32.gmra.mxu2 %v319_v35  ;;  %1006 = vmatmul.f32.gmra.mxu1 %v318_v45 }
 0x1aa   : > { %1074 = vmatmul.f32.gmra.mxu2 %v321_v54  ;;  %1009 = vmatmul.f32.gmra.mxu1 %v320_v56 }
 0x1b2   : > { %1077 = vmatmul.f32.gmra.mxu2 %v323_v3  ;;  %1012 = vmatmul.f32.gmra.mxu1 %v322_v17 }
 0x1ba   : > { %1080 = vmatmul.f32.gmra.mxu2 %v325_v52  ;;  %1015 = vmatmul.f32.gmra.mxu1 %v324_v9 }
 0x1c2   : > { %1083 = vmatmul.f32.gmra.mxu2 %v327_v10  ;;  %1018 = vmatmul.f32.gmra.mxu1 %v326_v20 }
 0x1ca   : > { %1086 = vmatmul.f32.gmra.mxu2 %v329_v0  ;;  %1021 = vmatmul.f32.gmra.mxu1 %v328_v50 }
 0x1d2   : > { %1089 = vmatmul.f32.gmra.mxu2 %v331_v16  ;;  %1024 = vmatmul.f32.gmra.mxu1 %v330_v41 }
 0x1da   : > { %1092 = vmatmul.f32.gmra.mxu2 %v333_v13  ;;  %1027 = vmatmul.f32.gmra.mxu1 %v332_v5 }
 0x1e2   : > { %1095 = vmatmul.f32.gmra.mxu2 %v335_v44  ;;  %1030 = vmatmul.f32.gmra.mxu1 %v334_v57 }
 0x1ea   : > { %1098 = vmatmul.f32.gmra.mxu2 %v337_v7  ;;  %1033 = vmatmul.f32.gmra.mxu1 %v336_v31 }
 0x1f2   : > { %1101 = vmatmul.f32.gmra.mxu2 %v339_v48  ;;  %1036 = vmatmul.f32.gmra.mxu1 %v338_v43 }
 0x1fa   : > { %1104 = vmatmul.f32.gmra.mxu2 %v341_v29  ;;  %1039 = vmatmul.f32.gmra.mxu1 %v340_v42 }
 0x202   : > { %1107 = vmatmul.f32.gmra.mxu2 %v343_v6  ;;  %1042 = vmatmul.f32.gmra.mxu1 %v342_v23 }
 0x20a   : > { %1110 = vmatmul.f32.gmra.mxu2 %v345_v2  ;;  %1045 = vmatmul.f32.gmra.mxu1 %v344_v36 }
 0x212   : > { %1113 = vmatmul.f32.gmra.mxu2 %v347_v60  ;;  %1048 = vmatmul.f32.gmra.mxu1 %v346_v58 }
 0x217   : > { %v1004_v47 = vpop.f32.mrf.mxu1 }
 0x218   : > { %1444 = shalt.err (!%p1441_p5)
}
 0x219   : > { %1357 = dma.vmem_to_hbm [thread:$0]  (%p1569_p4), %s1157_s14, 16, %s1159_s16, %s1142_s17  }
 0x21a   : > { %s2551_s21 = sshll.u32 %s1592_s11, 7 }
 0x21b   : > { %s2442_s8 = scalar_lea.vmem %s2486_s4, %s2551_s21 }
 0x21d   : > { %v1069_v19 = vpop.f32.mrf.mxu2 }
 0x21e   : > { %v1070_v1 = vadd.f32 %v1069_v19, %v1004_v47 }
 0x21f   : > { %v1007_v40 = vpop.f32.mrf.mxu1 }
 0x220   : > { %1117 = vst [vmem:[%s2442_s8] sm:$0xff] %v1070_v1 }
 0x225   : > { %v1072_v38 = vpop.f32.mrf.mxu2 }
 0x226   : > { %v1073_v25 = vadd.f32 %v1072_v38, %v1007_v40 }
 0x227   : > { %v1010_v26 = vpop.f32.mrf.mxu1 }
 0x228   : > { %1118 = vst [vmem:[%s2442_s8 + $0x8] sm:$0xff] %v1073_v25 }
 0x22d   : > { %v1075_v4 = vpop.f32.mrf.mxu2 }
 0x22e   : > { %v1076_v11 = vadd.f32 %v1075_v4, %v1010_v26 }
 0x22f   : > { %v1013_v33 = vpop.f32.mrf.mxu1 }
 0x230   : > { %1119 = vst [vmem:[%s2442_s8 + $0x10] sm:$0xff] %v1076_v11 }
 0x235   : > { %v1078_v39 = vpop.f32.mrf.mxu2 }
 0x236   : > { %v1079_v46 = vadd.f32 %v1078_v39, %v1013_v33 }
 0x237   : > { %v1016_v63 = vpop.f32.mrf.mxu1 }
 0x238   : > { %1120 = vst [vmem:[%s2442_s8 + $0x18] sm:$0xff] %v1079_v46 }
 0x23d   : > { %v1081_v8 = vpop.f32.mrf.mxu2 }
 0x23e   : > { %v1082_v18 = vadd.f32 %v1081_v8, %v1016_v63 }
 0x23f   : > { %v1019_v37 = vpop.f32.mrf.mxu1 }
 0x240   : > { %1121 = vst [vmem:[%s2442_s8 + $0x20] sm:$0xff] %v1082_v18 }
 0x245   : > { %v1084_v55 = vpop.f32.mrf.mxu2 }
 0x246   : > { %v1085_v12 = vadd.f32 %v1084_v55, %v1019_v37 }
 0x247   : > { %v1022_v34 = vpop.f32.mrf.mxu1 }
 0x248   : > { %1122 = vst [vmem:[%s2442_s8 + $0x28] sm:$0xff] %v1085_v12 }
 0x24d   : > { %v1087_v61 = vpop.f32.mrf.mxu2 }
 0x24e   : > { %v1088_v30 = vadd.f32 %v1087_v61, %v1022_v34 }
 0x24f   : > { %v1025_v14 = vpop.f32.mrf.mxu1 }
 0x250   : > { %1123 = vst [vmem:[%s2442_s8 + $0x30] sm:$0xff] %v1088_v30 }
 0x255   : > { %v1090_v22 = vpop.f32.mrf.mxu2 }
 0x256   : > { %v1091_v53 = vadd.f32 %v1090_v22, %v1025_v14 }
 0x257   : > { %v1028_v59 = vpop.f32.mrf.mxu1 }
 0x258   : > { %1124 = vst [vmem:[%s2442_s8 + $0x38] sm:$0xff] %v1091_v53 }
 0x25d   : > { %v1093_v15 = vpop.f32.mrf.mxu2 }
 0x25e   : > { %v1094_v51 = vadd.f32 %v1093_v15, %v1028_v59 }
 0x25f   : > { %v1031_v21 = vpop.f32.mrf.mxu1 }
 0x260   : > { %1125 = vst [vmem:[%s2442_s8 + $0x40] sm:$0xff] %v1094_v51 }
 0x265   : > { %v1096_v28 = vpop.f32.mrf.mxu2 }
 0x266   : > { %v1097_v49 = vadd.f32 %v1096_v28, %v1031_v21 }
 0x267   : > { %v1034_v24 = vpop.f32.mrf.mxu1 }
 0x268   : > { %1126 = vst [vmem:[%s2442_s8 + $0x48] sm:$0xff] %v1097_v49 }
 0x26d   : > { %v1099_v27 = vpop.f32.mrf.mxu2 }
 0x26e   : > { %v1100_v32 = vadd.f32 %v1099_v27, %v1034_v24 }
 0x26f   : > { %v1037_v62 = vpop.f32.mrf.mxu1 }
 0x270   : > { %1127 = vst [vmem:[%s2442_s8 + $0x50] sm:$0xff] %v1100_v32 }
 0x275   : > { %v1102_v35 = vpop.f32.mrf.mxu2 }
 0x276   : > { %v1103_v45 = vadd.f32 %v1102_v35, %v1037_v62 }
 0x277   : > { %v1040_v54 = vpop.f32.mrf.mxu1 }
 0x278   : > { %1128 = vst [vmem:[%s2442_s8 + $0x58] sm:$0xff] %v1103_v45 }
 0x27d   : > { %v1105_v56 = vpop.f32.mrf.mxu2 }
 0x27e   : > { %v1106_v3 = vadd.f32 %v1105_v56, %v1040_v54 }
 0x27f   : > { %v1043_v17 = vpop.f32.mrf.mxu1 }
 0x280   : > { %1129 = vst [vmem:[%s2442_s8 + $0x60] sm:$0xff] %v1106_v3 }
 0x285   : > { %v1108_v52 = vpop.f32.mrf.mxu2 }
 0x286   : > { %v1109_v9 = vadd.f32 %v1108_v52, %v1043_v17 }
 0x287   : > { %v1046_v10 = vpop.f32.mrf.mxu1 }
 0x288   : > { %1130 = vst [vmem:[%s2442_s8 + $0x68] sm:$0xff] %v1109_v9 }
 0x28d   : > { %v1111_v20 = vpop.f32.mrf.mxu2 }
 0x28e   : > { %v1112_v0 = vadd.f32 %v1111_v20, %v1046_v10 }
 0x28f   : > { %v1049_v50 = vpop.f32.mrf.mxu1 }
 0x290   : > { %1131 = vst [vmem:[%s2442_s8 + $0x70] sm:$0xff] %v1112_v0 }
 0x295   : > { %v1114_v16 = vpop.f32.mrf.mxu2 }
 0x296   : > { %v1115_v41 = vadd.f32 %v1114_v16, %v1049_v50 }
 0x298   : > { %1132 = vst [vmem:[%s2442_s8 + $0x78] sm:$0xff] %v1115_v41 }
 0x299 PF: > { %p1363_p4 = scmp.ge.s32.totalorder %s1495_s23, 2  ;;  %s1181_s28 = sand.u32 1, %s1475_s18  }
 0x29a   : > { %s1182_s11 = scalar_lea.sflag [#allocation3], %s1181_s28 }
 0x29b   : > { %p1360_p6 = pnand %p1363_p4, %p1576_p8 }
 0x29d   : > { %p1361_p7 = pneg %p1360_p6 }
 0x29f   : > { %1470 = dma.done.wait (%p1361_p7), %s1182_s11, 16  }
 0x2a0   : > { %1472 = vsyncadd (%p1361_p7), %s1182_s11, 4294967280  ;;  %s19_s23 = sadd.s32 1, %s1495_s23   ;;  %s2552_s18 = smov %s1479_s19 }
 0x2a1   : > { %p16_p9 = scmp.ge.s32.totalorder %s19_s23, 4   ;;  %s2553_s19 = smov %s1483_s20 }
 0x2a2   : > { %s2554_s20 = smov %s1582_s6  ;;  %s2555_s21 = smov %s1491_s22 }
 0x2a3   : > { %s2556_s22 = smov %s2558_s26  ;;  %18 = sbr.rel (!%p16_p9) target bundleno = 4 (0x4), region = 83 }
 0x2a8   :  { %1187 = vsyncpa [#allocation3], 1 }
 0x2a9   :  { %1189 = vsyncpa [#allocation3 + $0x1], 1 }

</bundles_post_ra>
